<compile_context>
chip_gen: v7x
topology: tpu7x:2x2x1
jax: 0.10.0
libtpu: 0.0.40
codegen_flags: <defaults>
</compile_context>

<pallas_src>
import functools

import jax
import jax.numpy as jnp
from jax import lax
from jax.experimental import pallas as pl
from jax.experimental.pallas import tpu as pltpu


# ---------------------------------------------------------------------------
# Pass 1: fused QKV projection (Q is pre-scaled by n_embd ** -0.5)
# ---------------------------------------------------------------------------
def _qkv_proj_kernel(x_ref, wqkv_ref, q_ref, k_ref, v_ref, *, scale, hp):
    # x_ref: (1, tr, C)   wqkv_ref: (C, 3*Hp)   q/k/v_ref: (1, tr, Hp)
    x = x_ref[0]
    qkv = jnp.dot(x, wqkv_ref[...], preferred_element_type=jnp.float32)
    q_ref[0] = (qkv[:, :hp] * scale).astype(q_ref.dtype)
    k_ref[0] = qkv[:, hp:2 * hp].astype(k_ref.dtype)
    v_ref[0] = qkv[:, 2 * hp:3 * hp].astype(v_ref.dtype)


# ---------------------------------------------------------------------------
# Pass 2: flash attention with online softmax
# ---------------------------------------------------------------------------
def _flash_attn_kernel(q_ref, k_ref, v_ref, o_ref, m_scr, l_scr, acc_scr, *,
                       is_decoder: bool, block_q: int, block_kv: int):
    # q_ref: (1, tq, Hp)  k_ref/v_ref: (1, tkv, Hp)  o_ref: (1, tq, Hp)
    # m_scr/l_scr: (tq, 1) f32   acc_scr: (tq, Hp) f32
    qi = pl.program_id(1)
    ki = pl.program_id(2)
    nk = pl.num_programs(2)

    @pl.when(ki == 0)
    def _init():
        m_scr[...] = jnp.full_like(m_scr, -jnp.inf)
        l_scr[...] = jnp.zeros_like(l_scr)
        acc_scr[...] = jnp.zeros_like(acc_scr)

    def _attend():
        q = q_ref[0]
        k = k_ref[0]
        v = v_ref[0]

        # (tq, tkv) scores: contract the head axis directly (no k.T copy).
        s = lax.dot_general(q, k, (((1,), (1,)), ((), ())),
                            preferred_element_type=jnp.float32)

        if is_decoder:
            row = qi * block_q + lax.broadcasted_iota(jnp.int32, s.shape, 0)
            col = ki * block_kv + lax.broadcasted_iota(jnp.int32, s.shape, 1)
            # Large finite negative (not -inf): NaN-safe for fully-masked rows
            # inside a diagonal tile.
            s = jnp.where(col <= row, s, jnp.float32(-1e30))

        m_prev = m_scr[...]
        m_new = jnp.maximum(m_prev, jnp.max(s, axis=-1, keepdims=True))
        alpha = jnp.exp(m_prev - m_new)
        p = jnp.exp(s - m_new)
        l_scr[...] = alpha * l_scr[...] + jnp.sum(p, axis=-1, keepdims=True)
        acc_scr[...] = alpha * acc_scr[...] + jnp.dot(
            p.astype(v.dtype), v, preferred_element_type=jnp.float32)
        m_scr[...] = m_new

    if is_decoder:
        # Skip kv tiles that lie entirely above the causal diagonal.
        pl.when(ki * block_kv <= qi * block_q + (block_q - 1))(_attend)
    else:
        _attend()

    @pl.when(ki == nk - 1)
    def _finalize():
        inv_l = pl.reciprocal(l_scr[...], approx=True)   # EUP slot, ~free
        o_ref[0] = (acc_scr[...] * inv_l).astype(o_ref.dtype)
        # Dropout(p=0.1) on attention weights: identity in eval mode.


# ---------------------------------------------------------------------------
# Weight prep + wrapper
# ---------------------------------------------------------------------------
def prepare_head_weights(w_key, w_query, w_value):
    """One-time weight prep: transpose nn.Linear (H, C) -> (C, H), zero-pad the
    head dim to a lane-dense multiple of 128, and concatenate [Wq|Wk|Wv]."""
    head_size, _ = w_key.shape
    h_pad = ((head_size + 127) // 128) * 128

    def prep(w):
        w = jnp.swapaxes(w, 0, 1)                       # (C, H)
        if h_pad != head_size:
            w = jnp.pad(w, ((0, 0), (0, h_pad - head_size)))
        return w

    w_qkv = jnp.concatenate([prep(w_query), prep(w_key), prep(w_value)],
                            axis=1)                     # (C, 3*Hp)
    return w_qkv, head_size, h_pad


def _pick_tile(T, requested=None):
    if requested is not None:
        return min(requested, T)
    for cand in (256, 128):                             # lane/sublane friendly
        if T % cand == 0:
            return cand
    return T                                            # full-dim fallback


def head_forward(x, w_qkv, head_size, h_pad, *, is_decoder=False,
                 block_q=None, block_kv=None):
    """x: (B, T, C); w_qkv: prepared (C, 3*Hp). Returns (B, T, head_size)."""
    B, T, C = x.shape
    Hp = h_pad
    dtype = x.dtype
    itemsize = jnp.dtype(dtype).itemsize
    scale = float(C) ** -0.5

    # ---- pass 1: fused QKV projection (each projection computed once) ----
    tr = _pick_tile(T)
    assert T % tr == 0, "sequence length must tile evenly"
    nr = T // tr

    proj_kernel = functools.partial(_qkv_proj_kernel, scale=scale, hp=Hp)
    proj_cost = pl.CostEstimate(
        flops=int(2 * B * T * C * 3 * Hp),
        transcendentals=0,
        bytes_accessed=int(B * T * C * itemsize + C * 3 * Hp * itemsize
                           + 3 * B * T * Hp * itemsize))

    q, k, v = pl.pallas_call(
        proj_kernel,
        out_shape=(jax.ShapeDtypeStruct((B, T, Hp), dtype),
                   jax.ShapeDtypeStruct((B, T, Hp), dtype),
                   jax.ShapeDtypeStruct((B, T, Hp), dtype)),
        grid_spec=pltpu.PrefetchScalarGridSpec(
            num_scalar_prefetch=0,
            grid=(B, nr),
            in_specs=[
                pl.BlockSpec((1, tr, C), lambda b, r: (b, r, 0)),       # x
                pl.BlockSpec((C, 3 * Hp), lambda b, r: (0, 0)),         # Wqkv
            ],
            out_specs=[
                pl.BlockSpec((1, tr, Hp), lambda b, r: (b, r, 0)),      # q
                pl.BlockSpec((1, tr, Hp), lambda b, r: (b, r, 0)),      # k
                pl.BlockSpec((1, tr, Hp), lambda b, r: (b, r, 0)),      # v
            ],
        ),
        compiler_params=pltpu.CompilerParams(
            dimension_semantics=("parallel", "parallel")),
        cost_estimate=proj_cost,
    )(x, w_qkv)

    # ---- pass 2: flash attention ----
    tq = _pick_tile(T, block_q)
    tkv = _pick_tile(T, block_kv)
    assert T % tq == 0 and T % tkv == 0, "sequence length must tile evenly"
    nq, nk = T // tq, T // tkv

    attn_kernel = functools.partial(_flash_attn_kernel, is_decoder=is_decoder,
                                    block_q=tq, block_kv=tkv)
    attn_flops = 4 * B * T * T * Hp
    attn_exp = B * T * T
    if is_decoder:
        attn_flops //= 2
        attn_exp //= 2
    attn_cost = pl.CostEstimate(
        flops=int(attn_flops),
        transcendentals=int(attn_exp),
        bytes_accessed=int(4 * B * T * Hp * itemsize))

    out = pl.pallas_call(
        attn_kernel,
        out_shape=jax.ShapeDtypeStruct((B, T, Hp), dtype),
        grid_spec=pltpu.PrefetchScalarGridSpec(
            num_scalar_prefetch=0,
            grid=(B, nq, nk),
            in_specs=[
                pl.BlockSpec((1, tq, Hp), lambda b, qi, ki: (b, qi, 0)),   # q
                pl.BlockSpec((1, tkv, Hp), lambda b, qi, ki: (b, ki, 0)),  # k
                pl.BlockSpec((1, tkv, Hp), lambda b, qi, ki: (b, ki, 0)),  # v
            ],
            out_specs=pl.BlockSpec((1, tq, Hp), lambda b, qi, ki: (b, qi, 0)),
            scratch_shapes=[
                pltpu.VMEM((tq, 1), jnp.float32),    # running max m
                pltpu.VMEM((tq, 1), jnp.float32),    # running sum l
                pltpu.VMEM((tq, Hp), jnp.float32),   # output accumulator
            ],
        ),
        compiler_params=pltpu.CompilerParams(
            dimension_semantics=("parallel", "parallel", "arbitrary")),
        cost_estimate=attn_cost,
    )(q, k, v)

    if Hp != head_size:
        out = out[..., :head_size]
    return out


def head_reference(x, w_key, w_query, w_value, *, is_decoder=False):
    """Plain-JAX reference matching the PyTorch module (eval mode)."""
    B, T, C = x.shape
    k = x @ w_key.T
    q = x @ w_query.T
    v = x @ w_value.T
    wei = (q @ jnp.swapaxes(k, -2, -1)) * (C ** -0.5)
    if is_decoder:
        mask = jnp.tril(jnp.ones((T, T), dtype=bool))
        wei = jnp.where(mask, wei, -jnp.inf)
    wei = jax.nn.softmax(wei, axis=-1)
    return wei @ v


if __name__ == "__main__":
    key = jax.random.PRNGKey(0)

    # (B, T, n_embd, head_size): small case + a multi-tile case that exercises
    # the online-softmax accumulation and the causal kv-tile skip.
    configs = [(2, 8, 32, 16), (1, 512, 64, 32)]

    for B, T, n_embd, head_size in configs:
        key, kx, kk, kq, kv = jax.random.split(key, 5)
        x = jax.random.normal(kx, (B, T, n_embd), dtype=jnp.float32)
        bound = 1.0 / (n_embd ** 0.5)
        w_key = jax.random.uniform(kk, (head_size, n_embd), jnp.float32, -bound, bound)
        w_query = jax.random.uniform(kq, (head_size, n_embd), jnp.float32, -bound, bound)
        w_value = jax.random.uniform(kv, (head_size, n_embd), jnp.float32, -bound, bound)

        # one-time weight prep (transpose + lane pad + concat), hoisted out of
        # the per-call path
        w_qkv, H, Hp = prepare_head_weights(w_key, w_query, w_value)

        for is_decoder in (True, False):
            out = head_forward(x, w_qkv, H, Hp, is_decoder=is_decoder)
            out = jax.block_until_ready(out)
            ref = head_reference(x, w_key, w_query, w_value, is_decoder=is_decoder)
            assert out.shape == (B, T, head_size)
            # approx reciprocal in the finalize step -> slightly relaxed tol
            assert jnp.allclose(out, ref, atol=2e-3, rtol=2e-3), \
                f"mismatch vs reference (B={B}, T={T}, is_decoder={is_decoder})"

    print("KERNEL_OK")
</pallas_src>

<mosaic_0001>
module attributes {stable_mosaic.version = 11 : i64} {
  func.func @_qkv_proj_kernel(%arg0: i32, %arg1: i32, %arg2: memref<1x8x32xf32, #tpu.memory_space<vmem>>, %arg3: memref<32x384xf32, #tpu.memory_space<vmem>>, %arg4: memref<1x8x128xf32, #tpu.memory_space<vmem>>, %arg5: memref<1x8x128xf32, #tpu.memory_space<vmem>>, %arg6: memref<1x8x128xf32, #tpu.memory_space<vmem>>) attributes {dimension_semantics = [#tpu.dimension_semantics<parallel>, #tpu.dimension_semantics<parallel>], iteration_bounds = array<i64: 2, 1>, scalar_prefetch = 0 : i64, scratch_operands = 0 : i64, tpu.core_type = #tpu.core_type<tc>, window_params = [{transform_indices = @transform_0, window_bounds = array<i64: 1, 8, 32>}, {pipeline_mode = #tpu.pipeline_mode<synchronous>, transform_indices = @transform_1, window_bounds = array<i64: 32, 384>}, {transform_indices = @transform_2, window_bounds = array<i64: 1, 8, 128>}, {transform_indices = @transform_3, window_bounds = array<i64: 1, 8, 128>}, {transform_indices = @transform_4, window_bounds = array<i64: 1, 8, 128>}]} {
    %c0 = arith.constant 0 : index
    %c0_0 = arith.constant 0 : index
    %c0_1 = arith.constant 0 : index
    %0 = vector.load %arg2[%c0, %c0_0, %c0_1] : memref<1x8x32xf32, #tpu.memory_space<vmem>>, vector<1x8x32xf32>
    %1 = vector.shape_cast %0 : vector<1x8x32xf32> to vector<8x32xf32>
    %c0_2 = arith.constant 0 : index
    %c0_3 = arith.constant 0 : index
    %2 = vector.load %arg3[%c0_2, %c0_3] : memref<32x384xf32, #tpu.memory_space<vmem>>, vector<32x384xf32>
    %cst = arith.constant dense<0.000000e+00> : vector<8x384xf32>
    %3 = tpu.matmul %1, %2, %cst {dimension_numbers = #tpu.dot_dimension_numbers<[1], [0], [0], [1], [0, 0, 1, 1], [], []>} : vector<8x32xf32>, vector<32x384xf32>, vector<8x384xf32> -> vector<8x384xf32>
    %4 = vector.extract_strided_slice %3 {offsets = [0, 0], sizes = [8, 128], strides = [1, 1]} : vector<8x384xf32> to vector<8x128xf32>
    %cst_4 = arith.constant 0.176776692 : f32
    %5 = vector.broadcast %cst_4 : f32 to vector<8x128xf32>
    %6 = arith.mulf %4, %5 : vector<8x128xf32>
    %c0_5 = arith.constant 0 : index
    %c0_6 = arith.constant 0 : index
    %c0_7 = arith.constant 0 : index
    %7 = vector.load %arg4[%c0_5, %c0_6, %c0_7] : memref<1x8x128xf32, #tpu.memory_space<vmem>>, vector<1x8x128xf32>
    %8 = vector.shape_cast %7 : vector<1x8x128xf32> to vector<8x128xf32>
    %9 = vector.shape_cast %6 : vector<8x128xf32> to vector<1x8x128xf32>
    tpu.vector_store %arg4[%c0_5, %c0_6, %c0_7], %9 {strides = array<i32>} : memref<1x8x128xf32, #tpu.memory_space<vmem>>, vector<1x8x128xf32>,
    %10 = vector.extract_strided_slice %3 {offsets = [0, 128], sizes = [8, 128], strides = [1, 1]} : vector<8x384xf32> to vector<8x128xf32>
    %c0_8 = arith.constant 0 : index
    %c0_9 = arith.constant 0 : index
    %c0_10 = arith.constant 0 : index
    %11 = vector.load %arg5[%c0_8, %c0_9, %c0_10] : memref<1x8x128xf32, #tpu.memory_space<vmem>>, vector<1x8x128xf32>
    %12 = vector.shape_cast %11 : vector<1x8x128xf32> to vector<8x128xf32>
    %13 = vector.shape_cast %10 : vector<8x128xf32> to vector<1x8x128xf32>
    tpu.vector_store %arg5[%c0_8, %c0_9, %c0_10], %13 {strides = array<i32>} : memref<1x8x128xf32, #tpu.memory_space<vmem>>, vector<1x8x128xf32>,
    %14 = vector.extract_strided_slice %3 {offsets = [0, 256], sizes = [8, 128], strides = [1, 1]} : vector<8x384xf32> to vector<8x128xf32>
    %c0_11 = arith.constant 0 : index
    %c0_12 = arith.constant 0 : index
    %c0_13 = arith.constant 0 : index
    %15 = vector.load %arg6[%c0_11, %c0_12, %c0_13] : memref<1x8x128xf32, #tpu.memory_space<vmem>>, vector<1x8x128xf32>
    %16 = vector.shape_cast %15 : vector<1x8x128xf32> to vector<8x128xf32>
    %17 = vector.shape_cast %14 : vector<8x128xf32> to vector<1x8x128xf32>
    tpu.vector_store %arg6[%c0_11, %c0_12, %c0_13], %17 {strides = array<i32>} : memref<1x8x128xf32, #tpu.memory_space<vmem>>, vector<1x8x128xf32>,
    return
  }
  func.func @transform_0(%arg0: i32, %arg1: i32) -> (i32, i32, i32) {
    %c0_i32 = arith.constant 0 : i32
    %c0_i32_0 = arith.constant 0 : i32
    return %arg0, %arg1, %c0_i32 : i32, i32, i32
  }
  func.func @transform_1(%arg0: i32, %arg1: i32) -> (i32, i32) {
    %c0_i32 = arith.constant 0 : i32
    %c0_i32_0 = arith.constant 0 : i32
    %c0_i32_1 = arith.constant 0 : i32
    return %c0_i32, %c0_i32_0 : i32, i32
  }
  func.func @transform_2(%arg0: i32, %arg1: i32) -> (i32, i32, i32) {
    %c0_i32 = arith.constant 0 : i32
    %c0_i32_0 = arith.constant 0 : i32
    return %arg0, %arg1, %c0_i32 : i32, i32, i32
  }
  func.func @transform_3(%arg0: i32, %arg1: i32) -> (i32, i32, i32) {
    %c0_i32 = arith.constant 0 : i32
    %c0_i32_0 = arith.constant 0 : i32
    return %arg0, %arg1, %c0_i32 : i32, i32, i32
  }
  func.func @transform_4(%arg0: i32, %arg1: i32) -> (i32, i32, i32) {
    %c0_i32 = arith.constant 0 : i32
    %c0_i32_0 = arith.constant 0 : i32
    return %arg0, %arg1, %c0_i32 : i32, i32, i32
  }
}

</mosaic_0001>

<bundles_post_ra>
// kernel: tpu_custom_call.1
= control target key start
LH: loop header
LB: loop body
LE: loop exit
PB: predicated region body
PF: predicated region fallthrough
CT: control target
= control target key end

     0   :  { %s1300_s0 = inlined_call_operand.hbm [shape: f32[2,8,32], index: 0, kind: input, shape index: {}]   ;;  %s1301_s1 = inlined_call_operand.hbm [shape: f32[32,384], index: 1, kind: input, shape index: {}]   ;;  %s1302_s2 = inlined_call_operand.hbm [shape: f32[2,8,128], index: 2, kind: output, shape index: {0}]   ;;  %s1303_s3 = inlined_call_operand.hbm [shape: f32[2,8,128], index: 3, kind: output, shape index: {1}]   ;;  %s1304_s4 = inlined_call_operand.hbm [shape: f32[2,8,128], index: 4, kind: output, shape index: {2}]  }
   0x1   :  { %1309 = sst [smem:[#allocation15_spill]] %s1300_s0 }
   0x2   :  { %10 = vsyncpa [#allocation3], 0 }
   0x3   :  { %12 = vsyncpa [#allocation3 + $0x1], 0 }
   0x4   :  { %13 = vsyncpa [#allocation6], 0 }
   0x5   :  { %14 = vsyncpa [#allocation4], 0 }
   0x6   :  { %16 = vsyncpa [#allocation4 + $0x1], 0 }
   0x7   :  { %17 = vsyncpa [#allocation9], 0 }
   0x8   :  { %19 = vsyncpa [#allocation9 + $0x1], 0  ;;  %s1017_s15 = smov 0   ;;  %s1019_s16 = smov 0  }
   0x9   :  { %s1021_s17 = smov 0   ;;  %s1023_s18 = smov 0  }
   0xa   :  { %s1025_s19 = smov 0   ;;  %s1027_s20 = smov 0  }
   0xb LB: > { %s1048_s21 = sadd.s32 4294967295, %s980_s20   ;;  %s1308_s22 = sadd.s32 4294967294, %s980_s20   ;;  %s980_s20 = sphi %s1027_s20, %s25_s20   ;;  %s976_s19 = sphi %s1025_s19, %s1330_s19   ;;  %s972_s18 = sphi %s1023_s18, %s1329_s18   ;;  %s968_s17 = sphi %s1021_s17, %s1328_s17   ;;  %s964_s16 = sphi %s1019_s16, %s1327_s16   ;;  %s960_s15 = sphi %s1017_s15, %s1326_s15  }
   0xc   : > { %p59_p0 = scmp.ne.s32.totalorder %s964_s16, %s960_s15  ;;  %p1305_p1 = scmp.eq.s32.totalorder %s1048_s21, 0 }
   0xd   : > { %p112_p3 = scmp.eq.s32.totalorder %s1308_s22, 1  ;;  %p637_p5 = scmp.ge.s32.totalorder %s980_s20, 1 }
   0xe   : > { %p1059_p4 = por %p1305_p1, %p59_p0  ;;  %p175_p7 = scmp.lt.s32.totalorder %s980_s20, 3 }
   0xf   : > { %p1064_p6 = por %p112_p3, %p59_p0  ;;  %s982_s26 = smov [#allocation5]  }
  0x10   : > { %s1310_s23 = scalar_select %p1059_p4, 1, 0 }
  0x11   : > { %s1311_s24 = scalar_select %p1064_p6, 1, 0 }
  0x12   : > { %p1069_p8 = pnand %p637_p5, %p175_p7  ;;  %s187_s27 = sshll.u32 %s982_s26, 4  ;;  %s188_s27 = int_to_ptr.vmem [resolvable:$true] %s187_s27 }
  0x13   : > { %s37_s29 = sadd.s32 1, %s976_s19  ;;  %s776_s6 = scalar_lea.hbm %s1301_s1, 1536 }
  0x14   : > { %s1312_s25 = scalar_select %p1069_p8, 1, 0 }
  0x15   : > { %p700_p9 = pneg %p1069_p8  ;;  %p777_p12 = scmp.ne.s32.totalorder %s1301_s1, %s776_s6 }
  0x16   : > { %p783_p5 = scmp.lt.u32.totalorder %s776_s6, %s1301_s1 }
  0x17   : > { %p1078_p11 = pnand %p700_p9, %p1305_p1 }
  0x19   : > { %p778_p13 = pneg %p1078_p11 }
  0x1b   : > { %p779_p0 = pnand %p778_p13, %p777_p12 }
  0x1d   : > { %p780_p3 = pneg %p779_p0 }
  0x1f   : > { %p785_p7 = pnand %p783_p5, %p780_p3 }
  0x21   : > { %788 = shalt.err (!%p785_p7)
}
  0x22   : > { %s789_s11 = scalar_lea.vmem %s188_s27, 1536  ;;  %p797_p2 = scmp.lt.s32.totalorder %s188_s27, %s188_s27 }
  0x23   : > { %p790_p9 = scmp.ne.s32.totalorder %s188_s27, %s789_s11  ;;  %p798_p6 = scmp.lt.s32.totalorder %s789_s11, %s789_s11 }
  0x25   : > { %p792_p10 = pnand %p790_p9, %p778_p13  ;;  %p799_p4 = por %p798_p6, %p797_p2 }
  0x27   : > { %p793_p1 = pneg %p792_p10 }
  0x29   : > { %p800_p8 = pnand %p799_p4, %p793_p1 }
  0x2b   : > { %803 = shalt.err (!%p800_p8)
}
  0x2c   : > { %s983_s12 = smov 384   ;;  %s984_s13 = smov 24  }
  0x2d   : > { %703 = dma.hbm_to_vmem [thread:$0]  (!%p1078_p11), %s1301_s1, 1536, %s188_s27, [#allocation6], %s983_s12, %s983_s12, %s984_s13  }
  0x2e   : > { %p39_p1 = scmp.ge.s32.totalorder %s37_s29, 2  ;;  %s46_s30 = sadd.s32 1, %s968_s17 }
  0x2f   : > { %p53_p2 = scmp.ne.s32.totalorder %s968_s17, %s964_s16  ;;  %p54_p4 = scmp.eq.s32.totalorder %s980_s20, 0 }
  0x30   : > { %s1332_s29 = smov (%p39_p1, %s37_s29), 0  ;;  %p1315_p8 = scmp.eq.s32.totalorder %s1048_s21, 1 }
  0x31   : > { %p1105_p6 = por %p54_p4, %p53_p2  ;;  %s41_s28 = ssub.s32 %s976_s19, %s1332_s29 }
  0x32   : > { %p1111_p10 = por %p1315_p8, %p53_p2  ;;  %p719_p12 = scmp.lt.s32.totalorder %s980_s20, 2 }
  0x33   : > { %p44_p11 = scmp.eq.s32.totalorder %s41_s28, 0  ;;  %s201_s27 = sand.u32 1, %s968_s17  }
  0x34   : > { %s640_s7 = sshll.u32 %s201_s27, 3  ;;  %s641_s9 = sshll.u32 %s976_s19, 7 }
  0x35   : > { %s1120_s8 = scalar_select %p44_p11, %s968_s17, %s46_s30  }
  0x36   : > { %s1317_s0 = sld [smem:[#allocation15_spill]]  ;;  %s205_s13 = scalar_lea.vmem [#allocation2], %s640_s7 }
  0x37   : > { %s213_s14 = sshll.u32 %s205_s13, 4  ;;  %p1132_p13 = pnand %p719_p12, %p1105_p6  ;;  %s1128_s14 = int_to_ptr.vmem [resolvable:$true] %s213_s14 }
  0x38   : > { %s202_s30 = scalar_lea.sflag [#allocation3], %s201_s27 }
  0x39   : > { %p806_p3 = pneg %p1132_p13 }
  0x3c   : > { %s1126_s12 = scalar_lea.hbm %s1317_s0, %s641_s9  ;;  %s809_s10 = scalar_lea.hbm %s1317_s0, 256 }
  0x3d   : > { %s804_s28 = scalar_lea.hbm %s1126_s12, 128  ;;  %p810_p9 = scmp.lt.u32.totalorder %s1126_s12, %s1317_s0 }
  0x3e   : > { %p805_p0 = scmp.ne.s32.totalorder %s1126_s12, %s804_s28  ;;  %p811_p1 = scmp.lt.u32.totalorder %s809_s10, %s804_s28 }
  0x3f   : > { %p813_p4 = scmp.lt.u32.totalorder %s804_s28, %s1126_s12 }
  0x40   : > { %p807_p5 = pnand %p806_p3, %p805_p0  ;;  %p812_p2 = por %p811_p1, %p810_p9 }
  0x42   : > { %p808_p7 = pneg %p807_p5  ;;  %p814_p6 = por %p813_p4, %p812_p2 }
  0x44   : > { %p815_p8 = pnand %p814_p6, %p808_p7 }
  0x46   : > { %818 = shalt.err (!%p815_p8)
}
  0x47   : > { %s819_s27 = scalar_lea.vmem %s1128_s14, 128  ;;  %s985_s13 = smov [#allocation2]  }
  0x48   : > { %p820_p12 = scmp.ne.s32.totalorder %s1128_s14, %s819_s27  ;;  %s824_s7 = sshll.u32 %s985_s13, 4  ;;  %s825_s7 = int_to_ptr.vmem [resolvable:$false] %s824_s7 }
  0x49   : > { %s826_s9 = scalar_lea.vmem %s825_s7, 256  ;;  %p827_p5 = scmp.lt.s32.totalorder %s1128_s14, %s825_s7 }
  0x4a   : > { %p822_p11 = pnand %p820_p12, %p806_p3  ;;  %p828_p9 = scmp.lt.s32.totalorder %s826_s9, %s819_s27 }
  0x4c   : > { %p823_p0 = pneg %p822_p11  ;;  %p829_p1 = por %p828_p9, %p827_p5 }
  0x4e   : > { %p830_p2 = pnand %p829_p1, %p823_p0 }
  0x50   : > { %833 = shalt.err (!%p830_p2)
}
  0x51   : > { %707 = dma.hbm_to_vmem [thread:$0]  (!%p1132_p13), %s1126_s12, 128, %s1128_s14, %s202_s30  }
  0x52   : > { %p1319_p7 = scmp.ne.s32.totalorder %s1312_s25, 0 }
  0x53   : > { %s1164_s28 = sand.u32 (!%p1319_p7), 1, %s964_s16   ;;  %p1320_p3 = scmp.ne.s32.totalorder (!%p1319_p7), %s1310_s23, 0 }
  0x54   : > { %222 = sbr.rel (%p1319_p7) target bundleno = 386 (0x182), region = 28  ;;  %s1167_s10 = sshll.u32 (!%p1319_p7), %s1164_s28, 3 }
  0x55   : > { %s225_s5 = scalar_lea.sflag (!%p1319_p7), [#allocation3], %s1164_s28  ;;  %s228_s11 = scalar_lea.vmem (!%p1319_p7), [#allocation2], %s1167_s10 }
  0x5b   : > { %943 = dma.done.wait (%p1320_p3), %s225_s5, 128  }
  0x5c   : > { %945 = vsyncadd (%p1320_p3), %s225_s5, 4294967168  ;;  %p1321_p13 = scmp.eq.s32.totalorder %s1048_s21, 0 }
  0x5e   : > { %947 = dma.done.wait (%p1321_p13), [#allocation6], 1536   ;;  %p1322_p4 = pmov %p1321_p13 }
  0x5f   : > { %v986_v0 = vmov 0.0|0.0   ;;  %v987_v1 = vmov 0.0   ;;  %vm988_vm0 = vmmov 0   ;;  %v269_v2 = vld [vmem:[#allocation5 + $0x8] sm:$0xff]  ;;  %v272_v3 = vld [vmem:[#allocation5 + $0x20] sm:$0xff]  ;;  %v271_v6 = vld [vmem:[#allocation5 + $0x18] sm:$0xff] }
  0x60   : > { %949 = vsyncadd (%p1322_p4), [#allocation6], 4294965760  ;;  %682 = vmatprep.subr.bf16.mxu1 %v986_v0  ;;  %348 = vmatprep.mubr.f32.mxu0 %v987_v1  ;;  %v268_v4 = vld [vmem:[#allocation5] sm:$0xff]  ;;  %v674_v5 = vpack.c.bf16 %v272_v3, %v269_v2  ;;  %v270_v7 = vld [vmem:[#allocation5 + $0x10] sm:$0xff]  ;;  %vm280_vm1 = vcmask 261120   ;;  %s259_s23 = scalar_lea.vmem [#allocation8], %s1167_s10 }
  0x61   : > { %671 = vmatprep.mubr.msk.f32.mxu1 %vm988_vm0, %v987_v1  ;;  %v273_v8 = vld [vmem:[#allocation5 + $0x28] sm:$0xff]  ;;  %v676_v9 = vpack.c.bf16 %v271_v6, %v268_v4  ;;  %v275_v11 = vld [vmem:[#allocation5 + $0x38] sm:$0xff]  ;;  %v278_v12 = vld [vmem:[#allocation5 + $0x50] sm:$0xff]  ;;  %s468_s25 = sshll.u32 %s259_s23, 4  ;;  %s434_s12 = sand.u32 1, %s1048_s21   ;;  %s1184_s25 = int_to_ptr.vmem [resolvable:$true] %s468_s25 }
  0x62   : > { %v683_v10 = vpack.c.bf16 %v273_v8, %v270_v7  ;;  %v274_v13 = vld [vmem:[#allocation5 + $0x30] sm:$0xff]  ;;  %675 = vmatprep.subr.bf16.mxu0 %v674_v5  ;;  %v678_v14 = vpack.c.bf16 %v278_v12, %v275_v11  ;;  %v277_v15 = vld [vmem:[#allocation5 + $0x48] sm:$0xff]  ;;  %v276_v16 = vld [vmem:[#allocation5 + $0x40] sm:$0xff]  ;;  %s653_s14 = sshll.u32 %s972_s18, 7  ;;  %s252_s26 = scalar_lea.vmem [#allocation7], %s1167_s10 }
  0x63   : > { %v279_v17 = vld [vmem:[#allocation5 + $0x58] sm:$0xff]  ;;  %677 = vmatpush1.bf16.msra.mxu0 %v676_v9  ;;  %v680_v18 = vpack.c.bf16 %v277_v15, %v274_v13  ;;  %s454_s30 = sshll.u32 %s252_s26, 4  ;;  %s266_s27 = scalar_lea.vmem [#allocation10], %s1167_s10  ;;  %s1198_s30 = int_to_ptr.vmem [resolvable:$true] %s454_s30 }
  0x64   : > { %684 = vmatpush3.bf16.msra.mxu1 %v683_v10  ;;  %v686_v19 = vpack.c.bf16 %v279_v17, %v276_v16  ;;  %679 = vmatprep.subr.bf16.mxu0 %v678_v14  ;;  %v267_v20 = vld [vmem:[%s228_s11] sm:$0xff]  ;;  %s482_s13 = sshll.u32 %s266_s27, 4  ;;  %s1191_s5 = scalar_lea.hbm %s1303_s3, %s653_s14  ;;  %s1200_s13 = int_to_ptr.vmem [resolvable:$true] %s482_s13 }
  0x65   : > { %685 = vmatprep.subr.bf16.mxu1 %v986_v0  ;;  %s1196_s10 = scalar_lea.hbm %s1302_s2, %s653_s14  ;;  %s1205_s7 = scalar_lea.hbm %s1304_s4, %s653_s14 }
  0x66   : > { %s1207_s9 = scalar_lea.sflag [#allocation9], %s434_s12  ;;  %s989_s18 = smov [#allocation8]  }
  0x67   : > { %681 = vmatpush1.bf16.msra.mxu0 %v680_v18  ;;  %s838_s21 = sshll.u32 %s989_s18, 4  ;;  %s839_s21 = int_to_ptr.vmem [resolvable:$false] %s838_s21 }
  0x68   : > { %687 = vmatpush3.bf16.msra.mxu1 %v686_v19  ;;  %s840_s0 = scalar_lea.vmem %s839_s21, 256  ;;  %p841_p11 = scmp.lt.s32.totalorder %s1184_s25, %s839_s21 }
  0x6a   : > { %648 = vmatmul.mubr.msk.f32.vlgmr.msra.gmra.mrb[0].mxu0 %vm280_vm1, %v267_v20 }
  0x6b   : > { %672 = vmatmul.mubr.msk.f32.vlgmr.msra.gmra.mrb[0].mxu1 %vm280_vm1, %v267_v20 }
 0x13d   : > { %v350_v21 = vpop.f32.mrb[0].mxu0 }
 0x13e   : > { %v421_v22 = vpop.f32.mrb[0].mxu1  ;;  %v425_v23 = vmul.f32 0.17677669, %v350_v21  ;;  %v352_v24 = vpop.f32.mrb[1].mxu0 }
 0x13f   : > { %428 = vst [vmem:[%s266_s27] sm:$0xff] %v421_v22  ;;  %v673_v25 = vpop.f32.mrb[1].mxu1  ;;  %427 = vst [vmem:[%s259_s23] sm:$0xff] %v352_v24  ;;  %s834_s27 = scalar_lea.vmem %s1184_s25, 128 }
 0x140   : > { %426 = vst [vmem:[%s252_s26] sm:$0xff] %v425_v23  ;;  %p835_p6 = scmp.ne.s32.totalorder %s1184_s25, %s834_s27  ;;  %p842_p0 = scmp.lt.s32.totalorder %s840_s0, %s834_s27 }
 0x142   : > { %p836_p8 = pnand %p835_p6, %p1111_p10  ;;  %p843_p5 = por %p842_p0, %p841_p11 }
 0x144   : > { %p837_p12 = pneg %p836_p8 }
 0x146   : > { %p844_p9 = pnand %p843_p5, %p837_p12 }
 0x148   : > { %847 = shalt.err (!%p844_p9)
}
 0x149   : > { %s848_s22 = scalar_lea.hbm %s1191_s5, 128  ;;  %s852_s14 = scalar_lea.hbm %s1303_s3, 256 }
 0x14a   : > { %p849_p1 = scmp.ne.s32.totalorder %s1191_s5, %s848_s22  ;;  %p853_p3 = scmp.lt.u32.totalorder %s1191_s5, %s1303_s3 }
 0x14b   : > { %p854_p13 = scmp.lt.u32.totalorder %s852_s14, %s848_s22  ;;  %p856_p6 = scmp.lt.u32.totalorder %s848_s22, %s1191_s5 }
 0x14c   : > { %p850_p2 = pnand %p849_p1, %p1111_p10 }
 0x14d   : > { %p855_p4 = por %p854_p13, %p853_p3 }
 0x14e   : > { %p851_p7 = pneg %p850_p2 }
 0x14f   : > { %p857_p8 = por %p856_p6, %p855_p4 }
 0x151   : > { %p858_p12 = pnand %p857_p8, %p851_p7 }
 0x153   : > { %861 = shalt.err (!%p858_p12)
}
 0x154   : > { %695 = dma.vmem_to_hbm [thread:$0]  (%p1111_p10), %s1184_s25, 128, %s1191_s5, %s1207_s9  }
 0x155   : > { %s430_s0 = scalar_lea.sflag [#allocation4], %s1164_s28  ;;  %s862_s27 = scalar_lea.vmem %s1198_s30, 128 }
 0x156   : > { %p863_p11 = scmp.ne.s32.totalorder %s1198_s30, %s862_s27  ;;  %s990_s18 = smov [#allocation7]  }
 0x157   : > { %s866_s21 = sshll.u32 %s990_s18, 4  ;;  %s867_s21 = int_to_ptr.vmem [resolvable:$false] %s866_s21 }
 0x158   : > { %p864_p0 = pnand %p863_p11, %p1111_p10  ;;  %s868_s22 = scalar_lea.vmem %s867_s21, 256 }
 0x159   : > { %p869_p9 = scmp.lt.s32.totalorder %s1198_s30, %s867_s21  ;;  %p870_p1 = scmp.lt.s32.totalorder %s868_s22, %s862_s27 }
 0x15a   : > { %p865_p5 = pneg %p864_p0 }
 0x15b   : > { %p871_p2 = por %p870_p1, %p869_p9 }
 0x15d   : > { %p872_p7 = pnand %p871_p2, %p865_p5 }
 0x15f   : > { %875 = shalt.err (!%p872_p7)
}
 0x160   : > { %s876_s28 = scalar_lea.hbm %s1196_s10, 128  ;;  %s880_s23 = scalar_lea.hbm %s1302_s2, 256 }
 0x161   : > { %p877_p3 = scmp.ne.s32.totalorder %s1196_s10, %s876_s28  ;;  %p881_p6 = scmp.lt.u32.totalorder %s1196_s10, %s1302_s2 }
 0x162   : > { %p882_p8 = scmp.lt.u32.totalorder %s880_s23, %s876_s28  ;;  %p884_p11 = scmp.lt.u32.totalorder %s876_s28, %s1196_s10 }
 0x163   : > { %p878_p13 = pnand %p877_p3, %p1111_p10 }
 0x164   : > { %p883_p12 = por %p882_p8, %p881_p6 }
 0x165   : > { %p879_p4 = pneg %p878_p13 }
 0x166   : > { %p885_p0 = por %p884_p11, %p883_p12 }
 0x168   : > { %p886_p5 = pnand %p885_p0, %p879_p4 }
 0x16a   : > { %889 = shalt.err (!%p886_p5)
}
 0x16b   : > { %694 = dma.vmem_to_hbm [thread:$0]  (%p1111_p10), %s1198_s30, 128, %s1196_s10, %s430_s0  }
 0x16c   : > { %s890_s26 = scalar_lea.vmem %s1200_s13, 128  ;;  %s991_s11 = smov [#allocation10]  }
 0x16d   : > { %p891_p9 = scmp.ne.s32.totalorder %s1200_s13, %s890_s26  ;;  %s894_s27 = sshll.u32 %s991_s11, 4  ;;  %s895_s27 = int_to_ptr.vmem [resolvable:$false] %s894_s27 }
 0x16e   : > { %s896_s18 = scalar_lea.vmem %s895_s27, 256  ;;  %p897_p7 = scmp.lt.s32.totalorder %s1200_s13, %s895_s27 }
 0x16f   : > { %p892_p1 = pnand %p891_p9, %p1111_p10  ;;  %p898_p3 = scmp.lt.s32.totalorder %s896_s18, %s890_s26 }
 0x171   : > { %p893_p2 = pneg %p892_p1  ;;  %p899_p13 = por %p898_p3, %p897_p7 }
 0x173   : > { %p900_p4 = pnand %p899_p13, %p893_p2 }
 0x175   : > { %903 = shalt.err (!%p900_p4)
}
 0x176   : > { %s904_s30 = scalar_lea.hbm %s1205_s7, 128  ;;  %s908_s21 = scalar_lea.hbm %s1304_s4, 256 }
 0x177   : > { %p905_p6 = scmp.ne.s32.totalorder %s1205_s7, %s904_s30  ;;  %p909_p11 = scmp.lt.u32.totalorder %s1205_s7, %s1304_s4 }
 0x178   : > { %p910_p0 = scmp.lt.u32.totalorder %s908_s21, %s904_s30  ;;  %p912_p9 = scmp.lt.u32.totalorder %s904_s30, %s1205_s7 }
 0x179   : > { %p906_p8 = pnand %p905_p6, %p1111_p10 }
 0x17a   : > { %p911_p5 = por %p910_p0, %p909_p11 }
 0x17b   : > { %p907_p12 = pneg %p906_p8 }
 0x17c   : > { %p913_p1 = por %p912_p9, %p911_p5 }
 0x17e   : > { %p914_p2 = pnand %p913_p1, %p907_p12 }
 0x180   : > { %917 = shalt.err (!%p914_p2)
}
 0x181   : > { %696 = dma.vmem_to_hbm [thread:$0]  (%p1111_p10), %s1200_s13, 128, %s1205_s7, %s1207_s9  }
 0x182 PF: > { %s494_s25 = sand.u32 1, %s960_s15   ;;  %p1323_p7 = scmp.ne.s32.totalorder %s1311_s24, 0 }
 0x183   : > { %p1324_p3 = scmp.ge.s32.totalorder %s980_s20, 2  ;;  %s495_s5 = scalar_lea.sflag [#allocation4], %s494_s25 }
 0x185   : > { %p709_p13 = pnand %p1324_p3, %p1323_p7 }
 0x187   : > { %951 = dma.done.wait (!%p709_p13), %s495_s5, 128  }
 0x188   : > { %953 = vsyncadd (!%p709_p13), %s495_s5, 4294967168  ;;  %s1325_s23 = sadd.s32 4294967294, %s980_s20  }
 0x189   : > { %s503_s12 = sand.u32 1, %s1325_s23  }
 0x18a   : > { %s504_s14 = scalar_lea.sflag [#allocation9], %s503_s12 }
 0x18b   : > { %955 = dma.done.wait (!%p709_p13), %s504_s14, 256  }
 0x18c   : > { %957 = vsyncadd (!%p709_p13), %s504_s14, 4294967040  ;;  %s25_s20 = sadd.s32 1, %s980_s20   ;;  %s1326_s15 = smov %s964_s16 }
 0x18d   : > { %p22_p10 = scmp.ge.s32.totalorder %s25_s20, 4   ;;  %s1327_s16 = smov %s968_s17 }
 0x18e   : > { %s1328_s17 = smov %s1120_s8  ;;  %s1329_s18 = smov %s976_s19 }
 0x18f   : > { %s1330_s19 = smov %s1332_s29  ;;  %24 = sbr.rel (!%p22_p10) target bundleno = 11 (0xb), region = 109 }
 0x196   :  { %518 = vsyncpa [#allocation3], 1 }
 0x197   :  { %520 = vsyncpa [#allocation3 + $0x1], 1 }
 0x198   :  { %521 = vsyncpa [#allocation6], 1 }
 0x199   :  { %522 = vsyncpa [#allocation4], 1 }
 0x19a   :  { %524 = vsyncpa [#allocation4 + $0x1], 1 }
 0x19b   :  { %525 = vsyncpa [#allocation9], 1 }
 0x19c   :  { %527 = vsyncpa [#allocation9 + $0x1], 1 }

</bundles_post_ra>
